<compile_context>
chip_gen: v7x
topology: tpu7x:2x2x1
jax: 0.10.0
libtpu: 0.0.40
codegen_flags: <defaults>
</compile_context>

<pallas_src>
import math

import jax
import jax.numpy as jnp
import numpy as np
from jax.experimental import pallas as pl
from jax.experimental.pallas import tpu as pltpu


def _round_up(x, m):
    return ((x + m - 1) // m) * m


# ----------------------------- Pallas kernel -----------------------------

def _time_embed_kernel(t_ref, emb_ref, w1_ref, b1_ref, w2_ref, b2_ref, o_ref):
    # t:   [TB, 1]        int32   timestep indices for this batch tile
    # emb: [T_pad, D_pad] bf16    frozen sinusoidal table (zero-padded)
    # w1:  [D_pad, F_pad] bf16    Linear(d_model, dim) weight, stored [in, out]
    # b1:  [1, F_pad]     f32
    # w2:  [F_pad, F_pad] bf16    Linear(dim, dim) weight, stored [in, out]
    # b2:  [1, F_pad]     f32
    # o:   [TB, F_pad]    f32
    tb = t_ref.shape[0]
    t_pad = emb_ref.shape[0]

    # Fused gather on the MXU: one_hot(t) @ table.  Padded table rows/cols are zero
    # and padded iota columns never match a valid timestep, so they contribute 0.
    row_ids = jax.lax.broadcasted_iota(jnp.int32, (tb, t_pad), 1)
    one_hot = jnp.where(row_ids == t_ref[...], 1.0, 0.0).astype(jnp.bfloat16)
    x = jnp.dot(one_hot, emb_ref[...], preferred_element_type=jnp.float32)

    # Linear -> Swish -> Linear.  bf16 matmul operands, f32 accumulation, f32 Swish.
    h = jnp.dot(x.astype(jnp.bfloat16), w1_ref[...],
                preferred_element_type=jnp.float32) + b1_ref[...]
    h = h * jax.nn.sigmoid(h)                       # Swish on VPU/EUP (f32)
    y = jnp.dot(h.astype(jnp.bfloat16), w2_ref[...],
                preferred_element_type=jnp.float32) + b2_ref[...]
    o_ref[...] = y.astype(o_ref.dtype)


# ------------------------------- wrapper -------------------------------

def time_embedding_forward(t, emb_table, w1, b1, w2, b2):
    """t: [B] int32 timesteps -> [B, dim] float32 (== PyTorch TimeEmbedding.forward)."""
    B = t.shape[0]
    T, d_model = emb_table.shape
    dim = w1.shape[1]

    LANE, SUBLANE = 128, 8
    T_pad = _round_up(T, LANE)        # lane dim of the in-kernel one-hot
    D_pad = _round_up(d_model, LANE)  # lane-dense embedding features
    F_pad = _round_up(dim, LANE)      # lane-dense hidden/output features

    # Batch tiling: one "parallel" grid axis (single step at B=8).
    B_pad = _round_up(B, SUBLANE)
    TB = B_pad if B_pad <= 512 else 512
    B_pad = _round_up(B_pad, TB)
    num_bt = B_pad // TB

    # Zero-pad everything to lane-dense shapes; cast matmul operands to bf16.
    t_col = jnp.zeros((B_pad, 1), jnp.int32).at[:B, 0].set(t.astype(jnp.int32))
    emb_p = jnp.zeros((T_pad, D_pad), jnp.bfloat16).at[:T, :d_model].set(
        emb_table.astype(jnp.bfloat16))
    w1_p = jnp.zeros((D_pad, F_pad), jnp.bfloat16).at[:d_model, :dim].set(
        w1.astype(jnp.bfloat16))
    w2_p = jnp.zeros((F_pad, F_pad), jnp.bfloat16).at[:dim, :dim].set(
        w2.astype(jnp.bfloat16))
    b1_p = jnp.zeros((1, F_pad), jnp.float32).at[:, :dim].set(b1.reshape(1, dim))
    b2_p = jnp.zeros((1, F_pad), jnp.float32).at[:, :dim].set(b2.reshape(1, dim))

    flops = 2 * B_pad * (T_pad * D_pad + D_pad * F_pad + F_pad * F_pad)
    bytes_accessed = (t_col.size * 4 + emb_p.size * 2 + w1_p.size * 2
                      + w2_p.size * 2 + b1_p.size * 4 + b2_p.size * 4
                      + B_pad * F_pad * 4)
    cost = pl.CostEstimate(flops=flops,
                           transcendentals=B_pad * F_pad,
                           bytes_accessed=bytes_accessed)

    out = pl.pallas_call(
        _time_embed_kernel,
        out_shape=jax.ShapeDtypeStruct((B_pad, F_pad), jnp.float32),
        grid=(num_bt,),
        in_specs=[
            pl.BlockSpec((TB, 1), lambda i: (i, 0)),          # t (per batch tile)
            pl.BlockSpec((T_pad, D_pad), lambda i: (0, 0)),   # table (resident)
            pl.BlockSpec((D_pad, F_pad), lambda i: (0, 0)),   # w1 (resident)
            pl.BlockSpec((1, F_pad), lambda i: (0, 0)),       # b1
            pl.BlockSpec((F_pad, F_pad), lambda i: (0, 0)),   # w2 (resident)
            pl.BlockSpec((1, F_pad), lambda i: (0, 0)),       # b2
        ],
        out_specs=pl.BlockSpec((TB, F_pad), lambda i: (i, 0)),
        compiler_params=pltpu.CompilerParams(
            dimension_semantics=("parallel",)),
        cost_estimate=cost,
    )(t_col, emb_p, w1_p, b1_p, w2_p, b2_p)

    return out[:B, :dim]


# --------------------------- parameter construction ---------------------------

def make_sinusoidal_table(T, d_model):
    """Exactly mirrors the PyTorch __init__ construction (interleaved sin/cos)."""
    assert d_model % 2 == 0
    freqs = jnp.arange(0, d_model, 2, dtype=jnp.float32) / d_model * math.log(10000.0)
    freqs = jnp.exp(-freqs)                                   # [d_model/2]
    pos = jnp.arange(T, dtype=jnp.float32)                    # [T]
    emb = pos[:, None] * freqs[None, :]                       # [T, d_model/2]
    emb = jnp.stack([jnp.sin(emb), jnp.cos(emb)], axis=-1)    # [T, d_model/2, 2]
    return emb.reshape(T, d_model)


def xavier_uniform(key, fan_in, fan_out):
    bound = math.sqrt(6.0 / (fan_in + fan_out))
    # stored as [in, out] (PyTorch weight transposed) so the kernel does x @ W
    return jax.random.uniform(key, (fan_in, fan_out), jnp.float32, -bound, bound)


# --------------------------------- main ---------------------------------

if __name__ == "__main__":
    T, d_model, dim, B = 16, 32, 64, 8

    key = jax.random.PRNGKey(0)
    k1, k2, kt = jax.random.split(key, 3)

    emb_table = make_sinusoidal_table(T, d_model)            # frozen nn.Embedding weights
    w1 = xavier_uniform(k1, d_model, dim)                    # Linear(d_model, dim)
    b1 = jnp.zeros((dim,), jnp.float32)                      # init.zeros_
    w2 = xavier_uniform(k2, dim, dim)                        # Linear(dim, dim)
    b2 = jnp.zeros((dim,), jnp.float32)

    t = jax.random.randint(kt, (B,), 0, T, dtype=jnp.int32)  # timestep indices

    out = time_embedding_forward(t, emb_table, w1, b1, w2, b2)
    out = jax.block_until_ready(out)

    # Pure-JAX f32 reference (PyTorch semantics).
    x_ref = emb_table[t]
    h_ref = x_ref @ w1 + b1
    h_ref = h_ref * jax.nn.sigmoid(h_ref)
    ref = h_ref @ w2 + b2

    assert out.shape == (B, dim)
    # bf16 matmul operands with f32 accumulation -> compare with bf16-level tolerance.
    np.testing.assert_allclose(np.asarray(out), np.asarray(ref), rtol=2e-2, atol=2e-2)
    print("KERNEL_OK")
</pallas_src>

<mosaic_0001>
module attributes {stable_mosaic.version = 11 : i64} {
  func.func @_time_embed_kernel(%arg0: i32, %arg1: memref<8x1xi32, #tpu.memory_space<vmem>>, %arg2: memref<128x128xbf16, #tpu.memory_space<vmem>>, %arg3: memref<128x128xbf16, #tpu.memory_space<vmem>>, %arg4: memref<1x128xf32, #tpu.memory_space<vmem>>, %arg5: memref<128x128xbf16, #tpu.memory_space<vmem>>, %arg6: memref<1x128xf32, #tpu.memory_space<vmem>>, %arg7: memref<8x128xf32, #tpu.memory_space<vmem>>) attributes {dimension_semantics = [#tpu.dimension_semantics<parallel>], iteration_bounds = array<i64: 1>, scalar_prefetch = 0 : i64, scratch_operands = 0 : i64, tpu.core_type = #tpu.core_type<tc>, window_params = [{transform_indices = @transform_0, window_bounds = array<i64: 8, 1>}, {pipeline_mode = #tpu.pipeline_mode<synchronous>, transform_indices = @transform_1, window_bounds = array<i64: 128, 128>}, {pipeline_mode = #tpu.pipeline_mode<synchronous>, transform_indices = @transform_2, window_bounds = array<i64: 128, 128>}, {pipeline_mode = #tpu.pipeline_mode<synchronous>, transform_indices = @transform_3, window_bounds = array<i64: 1, 128>}, {pipeline_mode = #tpu.pipeline_mode<synchronous>, transform_indices = @transform_4, window_bounds = array<i64: 128, 128>}, {pipeline_mode = #tpu.pipeline_mode<synchronous>, transform_indices = @transform_5, window_bounds = array<i64: 1, 128>}, {transform_indices = @transform_6, window_bounds = array<i64: 8, 128>}]} {
    %0 = tpu.iota {dimensions = array<i32: 1>} : vector<8x128xi32>
    %c0 = arith.constant 0 : index
    %c0_0 = arith.constant 0 : index
    %1 = vector.load %arg1[%c0, %c0_0] : memref<8x1xi32, #tpu.memory_space<vmem>>, vector<8x1xi32>
    %2 = vector.broadcast %1 : vector<8x1xi32> to vector<8x128xi32>
    %3 = arith.cmpi eq, %0, %2 : vector<8x128xi32>
    %cst = arith.constant 1.000000e+00 : f32
    %cst_1 = arith.constant 0.000000e+00 : f32
    %4 = vector.broadcast %cst : f32 to vector<8x128xf32>
    %5 = vector.broadcast %cst_1 : f32 to vector<8x128xf32>
    %6 = arith.select %3, %4, %5 : vector<8x128xi1>, vector<8x128xf32>
    %7 = arith.truncf %6 : vector<8x128xf32> to vector<8x128xbf16>
    %c0_2 = arith.constant 0 : index
    %c0_3 = arith.constant 0 : index
    %8 = vector.load %arg2[%c0_2, %c0_3] : memref<128x128xbf16, #tpu.memory_space<vmem>>, vector<128x128xbf16>
    %cst_4 = arith.constant dense<0.000000e+00> : vector<8x128xf32>
    %9 = tpu.matmul %7, %8, %cst_4 {dimension_numbers = #tpu.dot_dimension_numbers<[1], [0], [0], [1], [0, 0, 1, 1], [], []>} : vector<8x128xbf16>, vector<128x128xbf16>, vector<8x128xf32> -> vector<8x128xf32>
    %10 = arith.truncf %9 : vector<8x128xf32> to vector<8x128xbf16>
    %c0_5 = arith.constant 0 : index
    %c0_6 = arith.constant 0 : index
    %11 = vector.load %arg3[%c0_5, %c0_6] : memref<128x128xbf16, #tpu.memory_space<vmem>>, vector<128x128xbf16>
    %cst_7 = arith.constant dense<0.000000e+00> : vector<8x128xf32>
    %12 = tpu.matmul %10, %11, %cst_7 {dimension_numbers = #tpu.dot_dimension_numbers<[1], [0], [0], [1], [0, 0, 1, 1], [], []>} : vector<8x128xbf16>, vector<128x128xbf16>, vector<8x128xf32> -> vector<8x128xf32>
    %c0_8 = arith.constant 0 : index
    %c0_9 = arith.constant 0 : index
    %13 = vector.load %arg4[%c0_8, %c0_9] : memref<1x128xf32, #tpu.memory_space<vmem>>, vector<1x128xf32>
    %14 = vector.broadcast %13 : vector<1x128xf32> to vector<8x128xf32>
    %15 = arith.addf %12, %14 : vector<8x128xf32>
    %16 = arith.negf %15 : vector<8x128xf32>
    %17 = math.exp %16 : vector<8x128xf32>
    %cst_10 = arith.constant 1.000000e+00 : f32
    %18 = vector.broadcast %cst_10 : f32 to vector<8x128xf32>
    %19 = arith.addf %18, %17 : vector<8x128xf32>
    %20 = arith.divf %18, %19 : vector<8x128xf32>
    %21 = arith.mulf %15, %20 : vector<8x128xf32>
    %22 = arith.truncf %21 : vector<8x128xf32> to vector<8x128xbf16>
    %c0_11 = arith.constant 0 : index
    %c0_12 = arith.constant 0 : index
    %23 = vector.load %arg5[%c0_11, %c0_12] : memref<128x128xbf16, #tpu.memory_space<vmem>>, vector<128x128xbf16>
    %cst_13 = arith.constant dense<0.000000e+00> : vector<8x128xf32>
    %24 = tpu.matmul %22, %23, %cst_13 {dimension_numbers = #tpu.dot_dimension_numbers<[1], [0], [0], [1], [0, 0, 1, 1], [], []>} : vector<8x128xbf16>, vector<128x128xbf16>, vector<8x128xf32> -> vector<8x128xf32>
    %c0_14 = arith.constant 0 : index
    %c0_15 = arith.constant 0 : index
    %25 = vector.load %arg6[%c0_14, %c0_15] : memref<1x128xf32, #tpu.memory_space<vmem>>, vector<1x128xf32>
    %26 = vector.broadcast %25 : vector<1x128xf32> to vector<8x128xf32>
    %27 = arith.addf %24, %26 : vector<8x128xf32>
    %c0_16 = arith.constant 0 : index
    %c0_17 = arith.constant 0 : index
    %28 = vector.load %arg7[%c0_16, %c0_17] : memref<8x128xf32, #tpu.memory_space<vmem>>, vector<8x128xf32>
    tpu.vector_store %arg7[%c0_16, %c0_17], %27 {strides = array<i32>} : memref<8x128xf32, #tpu.memory_space<vmem>>, vector<8x128xf32>,
    return
  }
  func.func @transform_0(%arg0: i32) -> (i32, i32) {
    %c0_i32 = arith.constant 0 : i32
    %c0_i32_0 = arith.constant 0 : i32
    return %arg0, %c0_i32 : i32, i32
  }
  func.func @transform_1(%arg0: i32) -> (i32, i32) {
    %c0_i32 = arith.constant 0 : i32
    %c0_i32_0 = arith.constant 0 : i32
    %c0_i32_1 = arith.constant 0 : i32
    return %c0_i32, %c0_i32_0 : i32, i32
  }
  func.func @transform_2(%arg0: i32) -> (i32, i32) {
    %c0_i32 = arith.constant 0 : i32
    %c0_i32_0 = arith.constant 0 : i32
    %c0_i32_1 = arith.constant 0 : i32
    return %c0_i32, %c0_i32_0 : i32, i32
  }
  func.func @transform_3(%arg0: i32) -> (i32, i32) {
    %c0_i32 = arith.constant 0 : i32
    %c0_i32_0 = arith.constant 0 : i32
    %c0_i32_1 = arith.constant 0 : i32
    return %c0_i32, %c0_i32_0 : i32, i32
  }
  func.func @transform_4(%arg0: i32) -> (i32, i32) {
    %c0_i32 = arith.constant 0 : i32
    %c0_i32_0 = arith.constant 0 : i32
    %c0_i32_1 = arith.constant 0 : i32
    return %c0_i32, %c0_i32_0 : i32, i32
  }
  func.func @transform_5(%arg0: i32) -> (i32, i32) {
    %c0_i32 = arith.constant 0 : i32
    %c0_i32_0 = arith.constant 0 : i32
    %c0_i32_1 = arith.constant 0 : i32
    return %c0_i32, %c0_i32_0 : i32, i32
  }
  func.func @transform_6(%arg0: i32) -> (i32, i32) {
    %c0_i32 = arith.constant 0 : i32
    %c0_i32_0 = arith.constant 0 : i32
    return %arg0, %c0_i32 : i32, i32
  }
}

</mosaic_0001>

<bundles_post_ra>
// kernel: tpu_custom_call.1
= control target key start
LH: loop header
LB: loop body
LE: loop exit
PB: predicated region body
PF: predicated region fallthrough
CT: control target
= control target key end

     0   :  { %11 = vsyncpa [#allocation3], 0  ;;  %s824_s0 = inlined_call_operand.vmem [shape: s32[8,1], index: 0, kind: input, shape index: {}]   ;;  %s825_s1 = inlined_call_operand.hbm [shape: bf16[128,128], index: 1, kind: input, shape index: {}]   ;;  %s826_s2 = inlined_call_operand.hbm [shape: bf16[128,128], index: 2, kind: input, shape index: {}]   ;;  %s827_s3 = inlined_call_operand.vmem [shape: f32[1,128], index: 3, kind: input, shape index: {}]   ;;  %s828_s4 = inlined_call_operand.hbm [shape: bf16[128,128], index: 4, kind: input, shape index: {}]   ;;  %s829_s5 = inlined_call_operand.vmem [shape: f32[1,128], index: 5, kind: input, shape index: {}]   ;;  %s830_s6 = inlined_call_operand.hbm [shape: f32[8,128], index: 6, kind: output, shape index: {}]  }
   0x1   :  { %12 = vsyncpa [#allocation6], 0 }
   0x2   :  { %13 = vsyncpa [#allocation4], 0  ;;  %s676_s21 = smov [#allocation5]   ;;  %s677_s23 = smov [#allocation2]  }
   0x3   :  { %s33_s22 = sshll.u32 %s676_s21, 4  ;;  %s21_s24 = sshll.u32 %s677_s23, 4  ;;  %s34_s22 = int_to_ptr.vmem [resolvable:$true] %s33_s22  ;;  %s721_s24 = int_to_ptr.vmem [resolvable:$true] %s21_s24 }
   0x4   :  { %s582_s27 = scalar_lea.hbm %s826_s2, 1024 }
   0x5   :  { %p583_p0 = scmp.ne.s32.totalorder %s826_s2, %s582_s27  ;;  %p586_p1 = scmp.lt.u32.totalorder %s582_s27, %s826_s2 }
   0x7   :  { %p588_p2 = pnand %p586_p1, %p583_p0 }
   0x9   :  { %591 = shalt.err (!%p588_p2)
}
   0xa   :  { %s592_s8 = scalar_lea.vmem %s34_s22, 1024  ;;  %p597_p4 = scmp.lt.s32.totalorder %s34_s22, %s34_s22 }
   0xb   :  { %p593_p3 = scmp.ne.s32.totalorder %s34_s22, %s592_s8  ;;  %p598_p5 = scmp.lt.s32.totalorder %s592_s8, %s592_s8 }
   0xd   :  { %p599_p6 = por %p598_p5, %p597_p4 }
   0xf   :  { %p600_p7 = pnand %p599_p6, %p593_p3 }
  0x11   :  { %603 = shalt.err (!%p600_p7)
}
  0x12   :  { %s678_s9 = smov 64   ;;  %s679_s10 = smov 4  }
  0x13   :  { %39 = dma.hbm_to_vmem [thread:$0]  %s826_s2, 1024, %s34_s22, [#allocation6], %s678_s9, %s678_s9, %s679_s10  }
  0x14   :  { %s604_s15 = scalar_lea.hbm %s825_s1, 1024 }
  0x15   :  { %p605_p8 = scmp.ne.s32.totalorder %s825_s1, %s604_s15  ;;  %p608_p9 = scmp.lt.u32.totalorder %s604_s15, %s825_s1 }
  0x17   :  { %p610_p10 = pnand %p608_p9, %p605_p8 }
  0x19   :  { %613 = shalt.err (!%p610_p10)
}
  0x1a   :  { %s614_s20 = scalar_lea.vmem %s721_s24, 1024  ;;  %p619_p12 = scmp.lt.s32.totalorder %s721_s24, %s721_s24 }
  0x1b   :  { %p615_p11 = scmp.ne.s32.totalorder %s721_s24, %s614_s20  ;;  %p620_p13 = scmp.lt.s32.totalorder %s614_s20, %s614_s20 }
  0x1d   :  { %p621_p0 = por %p620_p13, %p619_p12 }
  0x1f   :  { %p622_p1 = pnand %p621_p0, %p615_p11 }
  0x21   :  { %625 = shalt.err (!%p622_p1)
}
  0x22   :  { %27 = dma.hbm_to_vmem [thread:$0]  %s825_s1, 1024, %s721_s24, [#allocation3], %s678_s9, %s678_s9, %s679_s10  }
  0x23   :  { %s680_s22 = smov [#allocation7]   ;;  %s626_s27 = scalar_lea.hbm %s828_s4, 1024 }
  0x24   :  { %s47_s23 = sshll.u32 %s680_s22, 4  ;;  %p627_p2 = scmp.ne.s32.totalorder %s828_s4, %s626_s27  ;;  %s48_s23 = int_to_ptr.vmem [resolvable:$true] %s47_s23 }
  0x25   :  { %p630_p3 = scmp.lt.u32.totalorder %s626_s27, %s828_s4 }
  0x27   :  { %p632_p4 = pnand %p630_p3, %p627_p2 }
  0x29   :  { %635 = shalt.err (!%p632_p4)
}
  0x2a   :  { %s636_s8 = scalar_lea.vmem %s48_s23, 1024  ;;  %p641_p6 = scmp.lt.s32.totalorder %s48_s23, %s48_s23 }
  0x2b   :  { %p637_p5 = scmp.ne.s32.totalorder %s48_s23, %s636_s8  ;;  %p642_p7 = scmp.lt.s32.totalorder %s636_s8, %s636_s8 }
  0x2d   :  { %p643_p8 = por %p642_p7, %p641_p6 }
  0x2f   :  { %p644_p9 = pnand %p643_p8, %p637_p5 }
  0x31   :  { %647 = shalt.err (!%p644_p9)
}
  0x32   :  { %53 = dma.hbm_to_vmem [thread:$0]  %s828_s4, 1024, %s48_s23, [#allocation6], %s678_s9, %s678_s9, %s679_s10  }
  0x33   :  { %670 = dma.done.wait [#allocation3], 1024  }
  0x34   :  { %671 = vsyncadd [#allocation3], 4294966272 }
  0x35   :  { %672 = dma.done.wait [#allocation6], 2048  }
  0x36   :  { %673 = vsyncadd [#allocation6], 4294965248  ;;  %v681_v0 = vmov 0   ;;  %v682_v1 = vmov 0.0   ;;  %v68_v2 = vld [vmem:[%s824_s0] sm:$0xff]  ;;  %vm683_vm0 = vmmov 0   ;;  %v66_v18 = vlaneseq }
  0x37   :  { %553 = vset.pattern.permute.xlu0 %v681_v0  ;;  %483 = vmatprep.subr.bf16.mxu0 %v682_v1  ;;  %v554_v3 = vld [vmem:[#allocation2] sm:$0xff]   ;;  %v555_v4 = vld [vmem:[#allocation2 + $0x8] sm:$0xff]   ;;  %v556_v5 = vld [vmem:[#allocation2 + $0x10] sm:$0xff]   ;;  %v684_v21 = vmov 1.0|1.0   ;;  %s685_s13 = smov [#allocation8]  }
  0x38   :  { %503 = vmatprep.subr.bf16.mxu1 %v682_v1  ;;  %70 = vperm.xlu0 %553, %v68_v2   ;;  %v562_v6 = vld [vmem:[#allocation5] sm:$0xff]   ;;  %v563_v7 = vld [vmem:[#allocation5 + $0x8] sm:$0xff]   ;;  %v557_v8 = vld [vmem:[#allocation2 + $0x18] sm:$0xff]   ;;  %v67_v19 = vand.u32 127, %v66_v18 }
  0x39   :  { %499 = vmatprep.mubr.msk.bf16.mxu0 %vm683_vm0, %v682_v1  ;;  %519 = vmatprep.mubr.msk.bf16.mxu1 %vm683_vm0, %v682_v1  ;;  %v564_v9 = vld [vmem:[#allocation5 + $0x10] sm:$0xff]   ;;  %v558_v10 = vld [vmem:[#allocation2 + $0x20] sm:$0xff]   ;;  %v565_v11 = vld [vmem:[#allocation5 + $0x18] sm:$0xff]  }
  0x3a   :  { %484 = vmatpush3.bf16.msra.mxu0 %v554_v3  ;;  %504 = vmatpush3.bf16.msra.mxu1 %v562_v6  ;;  %v559_v12 = vld [vmem:[#allocation2 + $0x28] sm:$0xff]   ;;  %v566_v13 = vld [vmem:[#allocation5 + $0x20] sm:$0xff]   ;;  %v560_v14 = vld [vmem:[#allocation2 + $0x30] sm:$0xff]  }
  0x3b   :  { %485 = vmatprep.subr.bf16.mxu0 %v682_v1  ;;  %505 = vmatprep.subr.bf16.mxu1 %v682_v1  ;;  %v567_v15 = vld [vmem:[#allocation5 + $0x28] sm:$0xff]   ;;  %v561_v16 = vld [vmem:[#allocation2 + $0x38] sm:$0xff]   ;;  %v568_v17 = vld [vmem:[#allocation5 + $0x30] sm:$0xff]  }
  0x3c   :  { %v569_v22 = vld [vmem:[#allocation5 + $0x38] sm:$0xff]   ;;  %v570_v28 = vld [vmem:[#allocation7] sm:$0xff]   ;;  %v571_v29 = vld [vmem:[#allocation7 + $0x8] sm:$0xff]  }
  0x3d   :  { %v572_v30 = vld [vmem:[#allocation7 + $0x10] sm:$0xff]   ;;  %v573_v31 = vld [vmem:[#allocation7 + $0x18] sm:$0xff]   ;;  %v574_v32 = vld [vmem:[#allocation7 + $0x20] sm:$0xff]  }
  0x3e   :  { %486 = vmatpush3.bf16.msra.mxu0 %v555_v4  ;;  %506 = vmatpush3.bf16.msra.mxu1 %v563_v7  ;;  %v575_v33 = vld [vmem:[#allocation7 + $0x28] sm:$0xff]   ;;  %v576_v34 = vld [vmem:[#allocation7 + $0x30] sm:$0xff]   ;;  %v577_v35 = vld [vmem:[#allocation7 + $0x38] sm:$0xff]  }
  0x3f   :  { %487 = vmatprep.subr.bf16.mxu0 %v682_v1  ;;  %507 = vmatprep.subr.bf16.mxu1 %v682_v1  ;;  %v437_v36 = vld [vmem:[%s827_s3] ss:$0 sm:$0xff]  ;;  %s417_s3 = sshll.u32 %s685_s13, 4  ;;  %s418_s3 = int_to_ptr.vmem [resolvable:$true] %s417_s3 }
  0x40   :  { %v447_v48 = vld [vmem:[%s829_s5] ss:$0 sm:$0xff]  ;;  %s648_s14 = scalar_lea.vmem %s418_s3, 128  ;;  %p653_p11 = scmp.lt.s32.totalorder %s418_s3, %s418_s3 }
  0x41   :  { %p649_p10 = scmp.ne.s32.totalorder %s418_s3, %s648_s14  ;;  %p654_p12 = scmp.lt.s32.totalorder %s648_s14, %s648_s14 }
  0x42   :  { %488 = vmatpush3.bf16.msra.mxu0 %v556_v5  ;;  %508 = vmatpush3.bf16.msra.mxu1 %v564_v9 }
  0x43   :  { %489 = vmatprep.subr.bf16.mxu0 %v682_v1  ;;  %509 = vmatprep.subr.bf16.mxu1 %v682_v1  ;;  %p655_p13 = por %p654_p12, %p653_p11 }
  0x45   :  { %p656_p0 = pnand %p655_p13, %p649_p10 }
  0x46   :  { %490 = vmatpush3.bf16.msra.mxu0 %v557_v8  ;;  %510 = vmatpush3.bf16.msra.mxu1 %v565_v11 }
  0x47   :  { %491 = vmatprep.subr.bf16.mxu0 %v682_v1  ;;  %511 = vmatprep.subr.bf16.mxu1 %v682_v1 }
  0x4a   :  { %492 = vmatpush3.bf16.msra.mxu0 %v558_v10  ;;  %512 = vmatpush3.bf16.msra.mxu1 %v566_v13 }
  0x4b   :  { %493 = vmatprep.subr.bf16.mxu0 %v682_v1  ;;  %513 = vmatprep.subr.bf16.mxu1 %v682_v1 }
  0x4e   :  { %494 = vmatpush3.bf16.msra.mxu0 %v559_v12  ;;  %514 = vmatpush3.bf16.msra.mxu1 %v567_v15 }
  0x4f   :  { %495 = vmatprep.subr.bf16.mxu0 %v682_v1  ;;  %515 = vmatprep.subr.bf16.mxu1 %v682_v1 }
  0x52   :  { %496 = vmatpush3.bf16.msra.mxu0 %v560_v14  ;;  %516 = vmatpush3.bf16.msra.mxu1 %v568_v17 }
  0x53   :  { %497 = vmatprep.subr.bf16.mxu0 %v682_v1  ;;  %517 = vmatprep.subr.bf16.mxu1 %v682_v1 }
  0x56   :  { %498 = vmatpush3.bf16.msra.mxu0 %v561_v16  ;;  %518 = vmatpush3.bf16.msra.mxu1 %v569_v22 }
  0x57   :  { %523 = vmatprep.subr.bf16.mxu0 %v682_v1 }
  0xb7   :  { %v71_v20 = vpop.permute.xlu0 %70 }
  0xb8   :  { %vm72_vm1 = vcmp.eq.s32.totalorder %v67_v19, %v71_v20 }
  0xb9   :  { %vm435_vm2 = vmpackc.low %vm72_vm1, %vm72_vm1 }
  0xba   :  { %500 = vmatmul.mubr.msk.bf16.vlgmr.msra.gmra.mrb[0].mxu0 %vm435_vm2, %v684_v21 }
  0xbb   :  { %539 = vmatprep.mubr.msk.bf16.mxu0 %vm683_vm0, %v682_v1  ;;  %524 = vmatpush3.bf16.msra.mxu0 %v570_v28 }
  0xbc   :  { %525 = vmatprep.subr.bf16.mxu0 %v682_v1 }
  0xbf   :  { %526 = vmatpush3.bf16.msra.mxu0 %v571_v29 }
  0xc0   :  { %527 = vmatprep.subr.bf16.mxu0 %v682_v1 }
  0xc3   :  { %528 = vmatpush3.bf16.msra.mxu0 %v572_v30 }
  0xc4   :  { %529 = vmatprep.subr.bf16.mxu0 %v682_v1 }
  0xc7   :  { %530 = vmatpush3.bf16.msra.mxu0 %v573_v31 }
  0xc8   :  { %531 = vmatprep.subr.bf16.mxu0 %v682_v1 }
  0xcb   :  { %532 = vmatpush3.bf16.msra.mxu0 %v574_v32 }
  0xcc   :  { %533 = vmatprep.subr.bf16.mxu0 %v682_v1 }
  0xcf   :  { %534 = vmatpush3.bf16.msra.mxu0 %v575_v33 }
  0xd0   :  { %535 = vmatprep.subr.bf16.mxu0 %v682_v1 }
  0xd3   :  { %536 = vmatpush3.bf16.msra.mxu0 %v576_v34 }
  0xd4   :  { %537 = vmatprep.subr.bf16.mxu0 %v682_v1 }
  0xd7   :  { %538 = vmatpush3.bf16.msra.mxu0 %v577_v35 }
 0x18d   :  { %v173_v23 = vpop.f32.mrb[0].mxu0 }
 0x18e   :  { %v179_v24 = vpack.c.bf16 %v173_v23, %v173_v23  ;;  %v501_v25 = vpop.f32.mrb[1].mxu0 }
 0x18f   :  { %v176_v26 = vpop.f32.mrb[2].mxu0 }
 0x190   :  { %v502_v27 = vpop.f32.mrb[3].mxu0  ;;  %520 = vmatmul.mubr.bf16.vlgmr.msra.gmra.mrb[0].mxu1 %v179_v24 }
 0x263   :  { %v285_v37 = vpop.f32.mrb[0].mxu1 }
 0x264   :  { %v286_v38 = vadd.f32 %v437_v36, %v285_v37  ;;  %v521_v39 = vpop.f32.mrb[1].mxu1 }
 0x265   :  { %v288_v40 = vpop.f32.mrb[2].mxu1 }
 0x266   :  { %v446_v41 = vmul.f32 -1.442695, %v286_v38  ;;  %v522_v42 = vpop.f32.mrb[3].mxu1 }
 0x268   :  { %578 = vpow2.f32 %v446_v41 }
 0x272   :  { %v579_v43 = vpop.eup %578 }
 0x273   :  { %v294_v44 = vadd.f32 1.0, %v579_v43 }
 0x275   :  { %580 = vrcp.f32 %v294_v44 }
 0x27f   :  { %v581_v45 = vpop.eup %580 }
 0x280   :  { %v297_v46 = vmul.f32 %v581_v45, %v286_v38 }
 0x282   :  { %v298_v47 = vpack.c.bf16 %v297_v46, %v297_v46 }
 0x284   :  { %540 = vmatmul.mubr.bf16.vlgmr.msra.gmra.mrb[4].mxu0 %v298_v47 }
 0x357   :  { %v404_v49 = vpop.f32.mrb[4].mxu0 }
 0x358   :  { %v405_v50 = vadd.f32 %v447_v48, %v404_v49  ;;  %v541_v51 = vpop.f32.mrb[5].mxu0 }
 0x359   :  { %v407_v52 = vpop.f32.mrb[6].mxu0 }
 0x35a   :  { %410 = vst [vmem:[#allocation8] sm:$0xff] %v405_v50  ;;  %v542_v53 = vpop.f32.mrb[7].mxu0 }
 0x35b   :  { %659 = shalt.err (!%p656_p0)
}
 0x35c   :  { %s660_s5 = scalar_lea.hbm %s830_s6, 128 }
 0x35d   :  { %p661_p1 = scmp.ne.s32.totalorder %s830_s6, %s660_s5  ;;  %p664_p2 = scmp.lt.u32.totalorder %s660_s5, %s830_s6 }
 0x35f   :  { %p666_p3 = pnand %p664_p2, %p661_p1 }
 0x361   :  { %669 = shalt.err (!%p666_p3)
}
 0x362   :  { %420 = dma.vmem_to_hbm [thread:$0]  %s418_s3, 128, %s830_s6, [#allocation4]  }
 0x363   :  { %674 = dma.done.wait [#allocation4], 128  }
 0x364   :  { %675 = vsyncadd [#allocation4], 4294967168 }
 0x365   :  { %424 = vsyncpa [#allocation3], 1 }
 0x366   :  { %425 = vsyncpa [#allocation6], 1 }
 0x367   :  { %426 = vsyncpa [#allocation4], 1 }

</bundles_post_ra>
